<compile_context>
chip_gen: v6e
topology: v6e:2x2x1
jax: 0.10.0
libtpu: 0.0.40
codegen_flags: <defaults>
</compile_context>

<pallas_src>
import jax
import jax.numpy as jnp
from jax.experimental import pallas as pl
from jax.experimental.pallas import tpu as pltpu


def _rup(x, m):
    return ((x + m - 1) // m) * m


def _choose_tile_b(B, Np):
    """Pick a batch tile so each grid step handles ~4096 points (TB*Np rows)."""
    target_points = 4096
    tb = max(1, target_points // max(Np, 1))
    tb = max(8, (tb // 8) * 8)           # multiple of 8 (sublane rule for mask/out)
    if tb >= B:
        return B                         # single tile: block dim == full dim is allowed
    return tb


def encoder_ds_kernel(q_ref, mask_ref, w1_ref, b1_ref, w2_ref, b2_ref,
                      w3_ref, b3_ref, w4_ref, b4_ref, alpha_ref, out_ref):
    # Block shapes:
    #   q_ref    : (TB, Np, In)   streamed per grid step
    #   mask_ref : (TB, Np)       streamed per grid step
    #   w1 (In,H) b1 (1,H)  w2 (H,H) b2 (1,H)  w3 (H,H) b3 (1,H)  w4 (H,Dp) b4 (1,Dp)
    #   alpha_ref: (3,) in SMEM (PReLU slopes, single-parameter PReLUs)
    #   out_ref  : (TB, Dp)
    a1 = alpha_ref[0]
    a2 = alpha_ref[1]
    a3 = alpha_ref[2]

    TB, Np, In = q_ref.shape
    H = w1_ref.shape[1]

    # Np % 8 == 0 (wrapper pads) -> this reshape is a pure relabel, no relayout.
    q2 = q_ref[...].reshape(TB * Np, In)              # (R, In), R = TB*Np
    mask = mask_ref[...]                              # (TB, Np)

    # ---- phi layer 1: tiny K=In contraction done as VPU broadcast-FMAs (MXU skipped)
    h = q2[:, 0:1] * w1_ref[0:1, :]                   # (R,1)*(1,H) -> (R,H)
    for k in range(1, In):                            # In is small & static -> unrolled
        h = h + q2[:, k:k + 1] * w1_ref[k:k + 1, :]
    h = h + b1_ref[...]                               # bias added once per tile
    h = jnp.where(h >= 0, h, a1 * h)                  # PReLU

    # ---- phi layer 2: K=H contraction on the MXU
    h = jnp.dot(h, w2_ref[...], preferred_element_type=jnp.float32) + b2_ref[...]
    h = jnp.where(h >= 0, h, a2 * h)                  # (R, H)

    # ---- masked mean pooling: fold mask * (1/denom) into one per-point weight
    denom = jnp.maximum(jnp.sum(mask, axis=1, keepdims=True), 1.0)   # (TB,1)
    inv = pl.reciprocal(denom, approx=True)                          # EUP slot
    wgt = mask * inv                                                 # (TB, Np)
    h3d = h.reshape(TB, Np, H)                                       # free relabel
    pooled = jnp.sum(h3d * wgt[:, :, None], axis=1)                  # (TB, H) sublane reduce

    # ---- rho: Linear -> PReLU -> Linear (output lane-padded to Dp)
    h3 = jnp.dot(pooled, w3_ref[...], preferred_element_type=jnp.float32) + b3_ref[...]
    h3 = jnp.where(h3 >= 0, h3, a3 * h3)
    z = jnp.dot(h3, w4_ref[...], preferred_element_type=jnp.float32) + b4_ref[...]

    out_ref[...] = z.astype(out_ref.dtype)            # (TB, Dp), unmasked lane-dense store


def encoder_ds(Q, params, mask=None, *, tile_b=None):
    """Q: (B, N, input_dim) float32; mask: (B, N) float32 or None. Returns (B, output_dim)."""
    B, N, In = Q.shape
    (w1, b1, w2, b2, w3, b3, w4, b4, alphas) = params
    H = w1.shape[1]
    D = w4.shape[1]

    if mask is None:
        mask = jnp.ones((B, N), dtype=Q.dtype)

    # Pad N to a multiple of 8 (zero Q rows + zero mask => no effect on the masked mean)
    Np = _rup(N, 8)
    if Np != N:
        Q = jnp.pad(Q, ((0, 0), (0, Np - N), (0, 0)))
        mask = jnp.pad(mask, ((0, 0), (0, Np - N)))

    # Choose / sanitize batch tile, pad B so the grid divides evenly.
    if tile_b is None:
        TB = _choose_tile_b(B, Np)
    else:
        TB = B if tile_b >= B else max(8, (tile_b // 8) * 8)
    Bp = _rup(B, TB)
    if Bp != B:
        Q = jnp.pad(Q, ((0, Bp - B), (0, 0), (0, 0)))
        mask = jnp.pad(mask, ((0, Bp - B), (0, 0)))

    # Pad output features to a multiple of 128 lanes (zeros) for unmasked stores.
    Dp = _rup(D, 128)
    if Dp != D:
        w4 = jnp.pad(w4, ((0, 0), (0, Dp - D)))
        b4 = jnp.pad(b4, ((0, 0), (0, Dp - D)))

    num_tiles = Bp // TB
    rows = TB * Np

    # Scoped-VMEM budget sized to the chosen tiles (double-buffered streams +
    # resident weights + live intermediates), capped below v7x's 64 MiB/TC.
    f32 = 4
    q_t = TB * Np * _rup(In, 128) * f32
    m_t = _rup(TB, 8) * _rup(Np, 128) * f32
    o_t = _rup(TB, 8) * Dp * f32
    h_t = _rup(rows, 8) * _rup(H, 128) * f32
    w_t = 4 * _rup(H, 8) * _rup(max(H, Dp), 128) * f32 + 4 * 8 * 128 * f32
    est = 2 * (q_t + m_t + o_t) + 4 * h_t + w_t + (2 << 20)
    vmem_limit = int(min(56 << 20, max(32 << 20, est)))

    vm = pltpu.MemorySpace.VMEM
    in_specs = [
        pl.BlockSpec((TB, Np, In), lambda i: (i, 0, 0), memory_space=vm),   # q  (streamed)
        pl.BlockSpec((TB, Np), lambda i: (i, 0), memory_space=vm),          # mask (streamed)
        pl.BlockSpec(w1.shape, lambda i: (0, 0), memory_space=vm),          # weights: grid-
        pl.BlockSpec(b1.shape, lambda i: (0, 0), memory_space=vm),          # invariant blocks,
        pl.BlockSpec(w2.shape, lambda i: (0, 0), memory_space=vm),          # DMA'd once and
        pl.BlockSpec(b2.shape, lambda i: (0, 0), memory_space=vm),          # kept resident
        pl.BlockSpec(w3.shape, lambda i: (0, 0), memory_space=vm),
        pl.BlockSpec(b3.shape, lambda i: (0, 0), memory_space=vm),
        pl.BlockSpec(w4.shape, lambda i: (0, 0), memory_space=vm),
        pl.BlockSpec(b4.shape, lambda i: (0, 0), memory_space=vm),
        pl.BlockSpec(memory_space=pltpu.MemorySpace.SMEM),                  # PReLU alphas
    ]
    out_spec = pl.BlockSpec((TB, Dp), lambda i: (i, 0), memory_space=vm)

    out = pl.pallas_call(
        encoder_ds_kernel,
        out_shape=jax.ShapeDtypeStruct((Bp, Dp), Q.dtype),
        grid=(num_tiles,),
        in_specs=in_specs,
        out_specs=out_spec,
        compiler_params=pltpu.CompilerParams(
            dimension_semantics=("parallel",),
            vmem_limit_bytes=vmem_limit,
        ),
    )(Q, mask, w1, b1, w2, b2, w3, b3, w4, b4, alphas)

    return out[:B, :D]


def init_params(key, input_dim=3, hidden_dim=32, output_dim=16):
    """nn.Linear-style init; weights stored (in_features, out_features). PReLU slope 0.25."""
    def linear(k, fan_in, fan_out):
        kw, kb = jax.random.split(k)
        bound = 1.0 / jnp.sqrt(fan_in)
        w = jax.random.uniform(kw, (fan_in, fan_out), jnp.float32, -bound, bound)
        b = jax.random.uniform(kb, (1, fan_out), jnp.float32, -bound, bound)
        return w, b

    k1, k2, k3, k4 = jax.random.split(key, 4)
    w1, b1 = linear(k1, input_dim, hidden_dim)
    w2, b2 = linear(k2, hidden_dim, hidden_dim)
    w3, b3 = linear(k3, hidden_dim, hidden_dim)
    w4, b4 = linear(k4, hidden_dim, output_dim)
    alphas = jnp.full((3,), 0.25, dtype=jnp.float32)
    return (w1, b1, w2, b2, w3, b3, w4, b4, alphas)


def encoder_ds_ref(Q, params, mask=None):
    """Pure-JAX reference matching the PyTorch forward."""
    (w1, b1, w2, b2, w3, b3, w4, b4, alphas) = params
    if mask is None:
        mask = jnp.ones(Q.shape[:2], dtype=Q.dtype)
    prelu = lambda x, a: jnp.where(x >= 0, x, a * x)
    h = prelu(Q @ w1 + b1, alphas[0])
    h = prelu(h @ w2 + b2, alphas[1])
    h = h * mask[..., None]
    pooled = jnp.sum(h, axis=1) / jnp.clip(jnp.sum(mask, axis=1, keepdims=True), 1.0, None)
    h = prelu(pooled @ w3 + b3, alphas[2])
    return h @ w4 + b4


if __name__ == "__main__":
    key = jax.random.PRNGKey(0)
    k_q, k_m, k_p, k_q2, k_m2 = jax.random.split(key, 5)

    # Tolerance accounts for the EUP approximate reciprocal in the pooling path.
    ATOL = RTOL = 5e-3

    # --- test 1: small shapes (single tile) ---
    B, N, IN_DIM, HID, OUT = 2, 8, 3, 32, 16
    Q = jax.random.normal(k_q, (B, N, IN_DIM), dtype=jnp.float32)
    mask = (jax.random.uniform(k_m, (B, N)) > 0.3).astype(jnp.float32)
    params = init_params(k_p, IN_DIM, HID, OUT)

    z = jax.block_until_ready(encoder_ds(Q, params, mask))
    z_ref = encoder_ds_ref(Q, params, mask)
    assert z.shape == (B, OUT)
    assert jnp.allclose(z, z_ref, atol=ATOL, rtol=RTOL), (
        f"test1 mismatch, max abs err={jnp.max(jnp.abs(z - z_ref))}")

    # --- test 2: multi-tile grid + batch padding + N padding + all-masked row ---
    B2, N2 = 20, 198
    Q2 = jax.random.normal(k_q2, (B2, N2, IN_DIM), dtype=jnp.float32)
    mask2 = (jax.random.uniform(k_m2, (B2, N2)) > 0.5).astype(jnp.float32)
    mask2 = mask2.at[3].set(0.0)   # exercises clamp(min=1) path
    z2 = jax.block_until_ready(encoder_ds(Q2, params, mask2, tile_b=8))
    z2_ref = encoder_ds_ref(Q2, params, mask2)
    assert z2.shape == (B2, OUT)
    assert jnp.allclose(z2, z2_ref, atol=ATOL, rtol=RTOL), (
        f"test2 mismatch, max abs err={jnp.max(jnp.abs(z2 - z2_ref))}")

    print("KERNEL_OK")
</pallas_src>

<mosaic_0001>
module attributes {stable_mosaic.version = 11 : i64} {
  func.func @encoder_ds_kernel(%arg0: i32, %arg1: memref<2x8x3xf32, #tpu.memory_space<vmem>>, %arg2: memref<2x8xf32, #tpu.memory_space<vmem>>, %arg3: memref<3x32xf32, #tpu.memory_space<vmem>>, %arg4: memref<1x32xf32, #tpu.memory_space<vmem>>, %arg5: memref<32x32xf32, #tpu.memory_space<vmem>>, %arg6: memref<1x32xf32, #tpu.memory_space<vmem>>, %arg7: memref<32x32xf32, #tpu.memory_space<vmem>>, %arg8: memref<1x32xf32, #tpu.memory_space<vmem>>, %arg9: memref<32x128xf32, #tpu.memory_space<vmem>>, %arg10: memref<1x128xf32, #tpu.memory_space<vmem>>, %arg11: memref<3xf32, #tpu.memory_space<smem>>, %arg12: memref<2x128xf32, #tpu.memory_space<vmem>>) attributes {dimension_semantics = [#tpu.dimension_semantics<parallel>], iteration_bounds = array<i64: 1>, scalar_prefetch = 0 : i64, scratch_operands = 0 : i64, tpu.core_type = #tpu.core_type<tc>, window_params = [{transform_indices = @transform_0, window_bounds = array<i64: 2, 8, 3>}, {transform_indices = @transform_1, window_bounds = array<i64: 2, 8>}, {pipeline_mode = #tpu.pipeline_mode<synchronous>, transform_indices = @transform_2, window_bounds = array<i64: 3, 32>}, {pipeline_mode = #tpu.pipeline_mode<synchronous>, transform_indices = @transform_3, window_bounds = array<i64: 1, 32>}, {pipeline_mode = #tpu.pipeline_mode<synchronous>, transform_indices = @transform_4, window_bounds = array<i64: 32, 32>}, {pipeline_mode = #tpu.pipeline_mode<synchronous>, transform_indices = @transform_5, window_bounds = array<i64: 1, 32>}, {pipeline_mode = #tpu.pipeline_mode<synchronous>, transform_indices = @transform_6, window_bounds = array<i64: 32, 32>}, {pipeline_mode = #tpu.pipeline_mode<synchronous>, transform_indices = @transform_7, window_bounds = array<i64: 1, 32>}, {pipeline_mode = #tpu.pipeline_mode<synchronous>, transform_indices = @transform_8, window_bounds = array<i64: 32, 128>}, {pipeline_mode = #tpu.pipeline_mode<synchronous>, transform_indices = @transform_9, window_bounds = array<i64: 1, 128>}, {transform_indices = @transform_10, window_bounds = array<i64: 3>}, {transform_indices = @transform_11, window_bounds = array<i64: 2, 128>}]} {
    %c0 = arith.constant 0 : index
    %0 = memref.load %arg11[%c0] : memref<3xf32, #tpu.memory_space<smem>>
    %c1 = arith.constant 1 : index
    %1 = memref.load %arg11[%c1] : memref<3xf32, #tpu.memory_space<smem>>
    %c2 = arith.constant 2 : index
    %2 = memref.load %arg11[%c2] : memref<3xf32, #tpu.memory_space<smem>>
    %c0_0 = arith.constant 0 : index
    %c0_1 = arith.constant 0 : index
    %c0_2 = arith.constant 0 : index
    %3 = vector.load %arg1[%c0_0, %c0_1, %c0_2] : memref<2x8x3xf32, #tpu.memory_space<vmem>>, vector<2x8x3xf32>
    %4 = vector.shape_cast %3 : vector<2x8x3xf32> to vector<16x3xf32>
    %c0_3 = arith.constant 0 : index
    %c0_4 = arith.constant 0 : index
    %5 = vector.load %arg2[%c0_3, %c0_4] : memref<2x8xf32, #tpu.memory_space<vmem>>, vector<2x8xf32>
    %6 = vector.extract_strided_slice %4 {offsets = [0, 0], sizes = [16, 1], strides = [1, 1]} : vector<16x3xf32> to vector<16x1xf32>
    %c0_5 = arith.constant 0 : index
    %c0_6 = arith.constant 0 : index
    %7 = vector.load %arg3[%c0_5, %c0_6] : memref<3x32xf32, #tpu.memory_space<vmem>>, vector<1x32xf32>
    %8 = vector.broadcast %6 : vector<16x1xf32> to vector<16x32xf32>
    %9 = vector.broadcast %7 : vector<1x32xf32> to vector<16x32xf32>
    %10 = arith.mulf %8, %9 : vector<16x32xf32>
    %11 = vector.extract_strided_slice %4 {offsets = [0, 1], sizes = [16, 1], strides = [1, 1]} : vector<16x3xf32> to vector<16x1xf32>
    %c1_7 = arith.constant 1 : index
    %c0_8 = arith.constant 0 : index
    %12 = vector.load %arg3[%c1_7, %c0_8] : memref<3x32xf32, #tpu.memory_space<vmem>>, vector<1x32xf32>
    %13 = vector.broadcast %11 : vector<16x1xf32> to vector<16x32xf32>
    %14 = vector.broadcast %12 : vector<1x32xf32> to vector<16x32xf32>
    %15 = arith.mulf %13, %14 : vector<16x32xf32>
    %16 = arith.addf %10, %15 : vector<16x32xf32>
    %17 = vector.extract_strided_slice %4 {offsets = [0, 2], sizes = [16, 1], strides = [1, 1]} : vector<16x3xf32> to vector<16x1xf32>
    %c2_9 = arith.constant 2 : index
    %c0_10 = arith.constant 0 : index
    %18 = vector.load %arg3[%c2_9, %c0_10] : memref<3x32xf32, #tpu.memory_space<vmem>>, vector<1x32xf32>
    %19 = vector.broadcast %17 : vector<16x1xf32> to vector<16x32xf32>
    %20 = vector.broadcast %18 : vector<1x32xf32> to vector<16x32xf32>
    %21 = arith.mulf %19, %20 : vector<16x32xf32>
    %22 = arith.addf %16, %21 : vector<16x32xf32>
    %c0_11 = arith.constant 0 : index
    %c0_12 = arith.constant 0 : index
    %23 = vector.load %arg4[%c0_11, %c0_12] : memref<1x32xf32, #tpu.memory_space<vmem>>, vector<1x32xf32>
    %24 = vector.broadcast %23 : vector<1x32xf32> to vector<16x32xf32>
    %25 = arith.addf %22, %24 : vector<16x32xf32>
    %cst = arith.constant 0.000000e+00 : f32
    %26 = vector.broadcast %cst : f32 to vector<16x32xf32>
    %27 = arith.cmpf oge, %25, %26 : vector<16x32xf32>
    %28 = vector.broadcast %0 : f32 to vector<16x32xf32>
    %29 = arith.mulf %28, %25 : vector<16x32xf32>
    %30 = arith.select %27, %25, %29 : vector<16x32xi1>, vector<16x32xf32>
    %c0_13 = arith.constant 0 : index
    %c0_14 = arith.constant 0 : index
    %31 = vector.load %arg5[%c0_13, %c0_14] : memref<32x32xf32, #tpu.memory_space<vmem>>, vector<32x32xf32>
    %cst_15 = arith.constant dense<0.000000e+00> : vector<16x32xf32>
    %32 = tpu.matmul %30, %31, %cst_15 {dimension_numbers = #tpu.dot_dimension_numbers<[1], [0], [0], [1], [0, 0, 1, 1], [], []>} : vector<16x32xf32>, vector<32x32xf32>, vector<16x32xf32> -> vector<16x32xf32>
    %c0_16 = arith.constant 0 : index
    %c0_17 = arith.constant 0 : index
    %33 = vector.load %arg6[%c0_16, %c0_17] : memref<1x32xf32, #tpu.memory_space<vmem>>, vector<1x32xf32>
    %34 = vector.broadcast %33 : vector<1x32xf32> to vector<16x32xf32>
    %35 = arith.addf %32, %34 : vector<16x32xf32>
    %cst_18 = arith.constant 0.000000e+00 : f32
    %36 = vector.broadcast %cst_18 : f32 to vector<16x32xf32>
    %37 = arith.cmpf oge, %35, %36 : vector<16x32xf32>
    %38 = vector.broadcast %1 : f32 to vector<16x32xf32>
    %39 = arith.mulf %38, %35 : vector<16x32xf32>
    %40 = arith.select %37, %35, %39 : vector<16x32xi1>, vector<16x32xf32>
    %cst_19 = arith.constant dense<0.000000e+00> : vector<2xf32>
    %41 = vector.multi_reduction <add>, %5, %cst_19 [1] : vector<2x8xf32> to vector<2xf32>
    %42 = vector.shape_cast %41 : vector<2xf32> to vector<2x1xf32>
    %cst_20 = arith.constant 1.000000e+00 : f32
    %43 = vector.broadcast %cst_20 : f32 to vector<2x1xf32>
    %44 = arith.maximumf %42, %43 : vector<2x1xf32>
    %45 = tpu.reciprocal %44 {approx = true} : vector<2x1xf32> -> vector<2x1xf32>
    %46 = vector.broadcast %45 : vector<2x1xf32> to vector<2x8xf32>
    %47 = arith.mulf %5, %46 : vector<2x8xf32>
    %48 = vector.shape_cast %40 : vector<16x32xf32> to vector<2x8x32xf32>
    %49 = vector.shape_cast %47 : vector<2x8xf32> to vector<2x8x1xf32>
    %50 = vector.broadcast %49 : vector<2x8x1xf32> to vector<2x8x32xf32>
    %51 = arith.mulf %48, %50 : vector<2x8x32xf32>
    %cst_21 = arith.constant dense<0.000000e+00> : vector<2x32xf32>
    %52 = vector.multi_reduction <add>, %51, %cst_21 [1] : vector<2x8x32xf32> to vector<2x32xf32>
    %c0_22 = arith.constant 0 : index
    %c0_23 = arith.constant 0 : index
    %53 = vector.load %arg7[%c0_22, %c0_23] : memref<32x32xf32, #tpu.memory_space<vmem>>, vector<32x32xf32>
    %cst_24 = arith.constant dense<0.000000e+00> : vector<2x32xf32>
    %54 = tpu.matmul %52, %53, %cst_24 {dimension_numbers = #tpu.dot_dimension_numbers<[1], [0], [0], [1], [0, 0, 1, 1], [], []>} : vector<2x32xf32>, vector<32x32xf32>, vector<2x32xf32> -> vector<2x32xf32>
    %c0_25 = arith.constant 0 : index
    %c0_26 = arith.constant 0 : index
    %55 = vector.load %arg8[%c0_25, %c0_26] : memref<1x32xf32, #tpu.memory_space<vmem>>, vector<1x32xf32>
    %56 = vector.broadcast %55 : vector<1x32xf32> to vector<2x32xf32>
    %57 = arith.addf %54, %56 : vector<2x32xf32>
    %cst_27 = arith.constant 0.000000e+00 : f32
    %58 = vector.broadcast %cst_27 : f32 to vector<2x32xf32>
    %59 = arith.cmpf oge, %57, %58 : vector<2x32xf32>
    %60 = vector.broadcast %2 : f32 to vector<2x32xf32>
    %61 = arith.mulf %60, %57 : vector<2x32xf32>
    %62 = arith.select %59, %57, %61 : vector<2x32xi1>, vector<2x32xf32>
    %c0_28 = arith.constant 0 : index
    %c0_29 = arith.constant 0 : index
    %63 = vector.load %arg9[%c0_28, %c0_29] : memref<32x128xf32, #tpu.memory_space<vmem>>, vector<32x128xf32>
    %cst_30 = arith.constant dense<0.000000e+00> : vector<2x128xf32>
    %64 = tpu.matmul %62, %63, %cst_30 {dimension_numbers = #tpu.dot_dimension_numbers<[1], [0], [0], [1], [0, 0, 1, 1], [], []>} : vector<2x32xf32>, vector<32x128xf32>, vector<2x128xf32> -> vector<2x128xf32>
    %c0_31 = arith.constant 0 : index
    %c0_32 = arith.constant 0 : index
    %65 = vector.load %arg10[%c0_31, %c0_32] : memref<1x128xf32, #tpu.memory_space<vmem>>, vector<1x128xf32>
    %66 = vector.broadcast %65 : vector<1x128xf32> to vector<2x128xf32>
    %67 = arith.addf %64, %66 : vector<2x128xf32>
    %c0_33 = arith.constant 0 : index
    %c0_34 = arith.constant 0 : index
    %68 = vector.load %arg12[%c0_33, %c0_34] : memref<2x128xf32, #tpu.memory_space<vmem>>, vector<2x128xf32>
    tpu.vector_store %arg12[%c0_33, %c0_34], %67 {strides = array<i32>} : memref<2x128xf32, #tpu.memory_space<vmem>>, vector<2x128xf32>,
    return
  }
  func.func @transform_0(%arg0: i32) -> (i32, i32, i32) {
    %c0_i32 = arith.constant 0 : i32
    %c0_i32_0 = arith.constant 0 : i32
    %c0_i32_1 = arith.constant 0 : i32
    return %arg0, %c0_i32, %c0_i32_0 : i32, i32, i32
  }
  func.func @transform_1(%arg0: i32) -> (i32, i32) {
    %c0_i32 = arith.constant 0 : i32
    %c0_i32_0 = arith.constant 0 : i32
    return %arg0, %c0_i32 : i32, i32
  }
  func.func @transform_2(%arg0: i32) -> (i32, i32) {
    %c0_i32 = arith.constant 0 : i32
    %c0_i32_0 = arith.constant 0 : i32
    %c0_i32_1 = arith.constant 0 : i32
    return %c0_i32, %c0_i32_0 : i32, i32
  }
  func.func @transform_3(%arg0: i32) -> (i32, i32) {
    %c0_i32 = arith.constant 0 : i32
    %c0_i32_0 = arith.constant 0 : i32
    %c0_i32_1 = arith.constant 0 : i32
    return %c0_i32, %c0_i32_0 : i32, i32
  }
  func.func @transform_4(%arg0: i32) -> (i32, i32) {
    %c0_i32 = arith.constant 0 : i32
    %c0_i32_0 = arith.constant 0 : i32
    %c0_i32_1 = arith.constant 0 : i32
    return %c0_i32, %c0_i32_0 : i32, i32
  }
  func.func @transform_5(%arg0: i32) -> (i32, i32) {
    %c0_i32 = arith.constant 0 : i32
    %c0_i32_0 = arith.constant 0 : i32
    %c0_i32_1 = arith.constant 0 : i32
    return %c0_i32, %c0_i32_0 : i32, i32
  }
  func.func @transform_6(%arg0: i32) -> (i32, i32) {
    %c0_i32 = arith.constant 0 : i32
    %c0_i32_0 = arith.constant 0 : i32
    %c0_i32_1 = arith.constant 0 : i32
    return %c0_i32, %c0_i32_0 : i32, i32
  }
  func.func @transform_7(%arg0: i32) -> (i32, i32) {
    %c0_i32 = arith.constant 0 : i32
    %c0_i32_0 = arith.constant 0 : i32
    %c0_i32_1 = arith.constant 0 : i32
    return %c0_i32, %c0_i32_0 : i32, i32
  }
  func.func @transform_8(%arg0: i32) -> (i32, i32) {
    %c0_i32 = arith.constant 0 : i32
    %c0_i32_0 = arith.constant 0 : i32
    %c0_i32_1 = arith.constant 0 : i32
    return %c0_i32, %c0_i32_0 : i32, i32
  }
  func.func @transform_9(%arg0: i32) -> (i32, i32) {
    %c0_i32 = arith.constant 0 : i32
    %c0_i32_0 = arith.constant 0 : i32
    %c0_i32_1 = arith.constant 0 : i32
    return %c0_i32, %c0_i32_0 : i32, i32
  }
  func.func @transform_10(%arg0: i32) -> i32 {
    %c0_i32 = arith.constant 0 : i32
    %c0_i32_0 = arith.constant 0 : i32
    return %c0_i32 : i32
  }
  func.func @transform_11(%arg0: i32) -> (i32, i32) {
    %c0_i32 = arith.constant 0 : i32
    %c0_i32_0 = arith.constant 0 : i32
    return %arg0, %c0_i32 : i32, i32
  }
}

</mosaic_0001>

<bundles_post_ra>
// kernel: tpu_custom_call.1
= control target key start
LH: loop header
LB: loop body
LE: loop exit
PB: predicated region body
PF: predicated region fallthrough
CT: control target
= control target key end

     0   :  { %16 = vsyncpa [#allocation3], 0  ;;  %s915_s0 = inlined_call_operand.vmem [shape: f32[2,8,3], index: 0, kind: input, shape index: {}]   ;;  %s916_s1 = inlined_call_operand.hbm [shape: f32[2,8], index: 1, kind: input, shape index: {}]   ;;  %s917_s2 = inlined_call_operand.hbm [shape: f32[3,32], index: 2, kind: input, shape index: {}]   ;;  %s918_s3 = inlined_call_operand.hbm [shape: f32[1,32], index: 3, kind: input, shape index: {}]   ;;  %s919_s4 = inlined_call_operand.hbm [shape: f32[32,32], index: 4, kind: input, shape index: {}]   ;;  %s920_s5 = inlined_call_operand.hbm [shape: f32[1,32], index: 5, kind: input, shape index: {}]   ;;  %s921_s6 = inlined_call_operand.vmem [shape: f32[32,32], index: 6, kind: input, shape index: {}]   ;;  %s922_s7 = inlined_call_operand.vmem [shape: f32[1,32], index: 7, kind: input, shape index: {}]   ;;  %s923_s8 = inlined_call_operand.hbm [shape: f32[32,128], index: 8, kind: input, shape index: {}]   ;;  %s924_s9 = inlined_call_operand.vmem [shape: f32[1,128], index: 9, kind: input, shape index: {}]   ;;  %s925_s10 = inlined_call_operand.vmem [shape: f32[3], index: 10, kind: input, shape index: {}]   ;;  %s926_s11 = inlined_call_operand.hbm [shape: f32[2,128], index: 11, kind: output, shape index: {}]  }
   0x1   :  { %17 = vsyncpa [#allocation7], 0 }
   0x2   :  { %18 = vsyncpa [#allocation10], 0 }
   0x3   :  { %19 = vsyncpa [#allocation13], 0 }
   0x4   :  { %20 = vsyncpa [#allocation5], 0 }
   0x5   :  { %21 = vsyncpa [#allocation4], 0  ;;  %s780_s17 = smov [#allocation6]   ;;  %s781_s19 = smov [#allocation9]  }
   0x6   :  { %s40_s18 = sshll.u32 %s780_s17, 4  ;;  %s59_s20 = sshll.u32 %s781_s19, 4  ;;  %s41_s18 = int_to_ptr.vmem [resolvable:$true] %s40_s18  ;;  %s60_s20 = int_to_ptr.vmem [resolvable:$true] %s59_s20 }
   0x7   :  { %s624_s21 = scalar_lea.vmem %s41_s18, 64  ;;  %p629_p1 = scmp.lt.s32.totalorder %s41_s18, %s41_s18 }
   0x8   :  { %p625_p0 = scmp.ne.s32.totalorder %s41_s18, %s624_s21  ;;  %p630_p2 = scmp.lt.s32.totalorder %s624_s21, %s624_s21 }
   0xa   :  { %p631_p3 = por %p630_p2, %p629_p1 }
   0xc   :  { %p632_p4 = pnand %p631_p3, %p625_p0 }
   0xe   :  { %635 = shalt.err (!%p632_p4)
}
   0xf   :  { %43 = dma.hbm_to_vmem [thread:$0]  %s917_s2, 64, %s41_s18, [#allocation7]  }
  0x10   :  { %s644_s24 = scalar_lea.vmem %s60_s20, 512  ;;  %p649_p6 = scmp.lt.s32.totalorder %s60_s20, %s60_s20 }
  0x11   :  { %p645_p5 = scmp.ne.s32.totalorder %s60_s20, %s644_s24  ;;  %p650_p7 = scmp.lt.s32.totalorder %s644_s24, %s644_s24 }
  0x13   :  { %p651_p8 = por %p650_p7, %p649_p6 }
  0x15   :  { %p652_p9 = pnand %p651_p8, %p645_p5 }
  0x17   :  { %655 = shalt.err (!%p652_p9)
}
  0x18   :  { %s782_s25 = smov 128   ;;  %s783_s26 = smov 8  }
  0x19   :  { %65 = dma.hbm_to_vmem [thread:$0]  %s919_s4, 512, %s60_s20, [#allocation10], %s782_s25, %s782_s25, %s783_s26  }
  0x1a   :  { %s784_s29 = smov [#allocation2]   ;;  %s785_s12 = smov [#allocation8]  }
  0x1b   :  { %s30_s30 = sshll.u32 %s784_s29, 4  ;;  %s50_s2 = sshll.u32 %s785_s12, 4  ;;  %s31_s30 = int_to_ptr.vmem [resolvable:$true] %s30_s30  ;;  %s51_s2 = int_to_ptr.vmem [resolvable:$true] %s50_s2 }
  0x1c   :  { %s664_s13 = scalar_lea.vmem %s31_s30, 32  ;;  %p669_p11 = scmp.lt.s32.totalorder %s31_s30, %s31_s30 }
  0x1d   :  { %p665_p10 = scmp.ne.s32.totalorder %s31_s30, %s664_s13  ;;  %p670_p12 = scmp.lt.s32.totalorder %s664_s13, %s664_s13 }
  0x1f   :  { %p671_p13 = por %p670_p12, %p669_p11 }
  0x21   :  { %p672_p0 = pnand %p671_p13, %p665_p10 }
  0x23   :  { %675 = shalt.err (!%p672_p0)
}
  0x24   :  { %33 = dma.hbm_to_vmem [thread:$0]  %s916_s1, 32, %s31_s30, [#allocation3]  }
  0x25   :  { %s684_s16 = scalar_lea.vmem %s51_s2, 16  ;;  %s688_s4 = scalar_lea.vmem %s51_s2, 32 }
  0x26   :  { %p685_p1 = scmp.ne.s32.totalorder %s51_s2, %s684_s16  ;;  %p689_p2 = scmp.lt.s32.totalorder %s51_s2, %s51_s2 }
  0x27   :  { %p690_p3 = scmp.lt.s32.totalorder %s688_s4, %s684_s16 }
  0x29   :  { %p691_p4 = por %p690_p3, %p689_p2 }
  0x2b   :  { %p692_p5 = pnand %p691_p4, %p685_p1 }
  0x2d   :  { %695 = shalt.err (!%p692_p5)
}
  0x2e   :  { %53 = dma.hbm_to_vmem [thread:$0]  %s918_s3, 16, %s51_s2, [#allocation7]  }
  0x2f   :  { %s786_s19 = smov [#allocation11]   ;;  %s787_s21 = smov [#allocation12]  }
  0x30   :  { %s72_s20 = sshll.u32 %s786_s19, 4  ;;  %s85_s22 = sshll.u32 %s787_s21, 4  ;;  %s73_s20 = int_to_ptr.vmem [resolvable:$true] %s72_s20  ;;  %s86_s22 = int_to_ptr.vmem [resolvable:$true] %s85_s22 }
  0x31   :  { %s704_s23 = scalar_lea.vmem %s73_s20, 16  ;;  %s708_s1 = scalar_lea.vmem %s73_s20, 32 }
  0x32   :  { %p705_p6 = scmp.ne.s32.totalorder %s73_s20, %s704_s23  ;;  %p709_p7 = scmp.lt.s32.totalorder %s73_s20, %s73_s20 }
  0x33   :  { %p710_p8 = scmp.lt.s32.totalorder %s708_s1, %s704_s23 }
  0x35   :  { %p711_p9 = por %p710_p8, %p709_p7 }
  0x37   :  { %p712_p10 = pnand %p711_p9, %p705_p6 }
  0x39   :  { %715 = shalt.err (!%p712_p10)
}
  0x3a   :  { %75 = dma.hbm_to_vmem [thread:$0]  %s920_s5, 16, %s73_s20, [#allocation10]  }
  0x3b   :  { %s724_s28 = scalar_lea.vmem %s86_s22, 512  ;;  %p729_p12 = scmp.lt.s32.totalorder %s86_s22, %s86_s22 }
  0x3c   :  { %p725_p11 = scmp.ne.s32.totalorder %s86_s22, %s724_s28  ;;  %p730_p13 = scmp.lt.s32.totalorder %s724_s28, %s724_s28 }
  0x3e   :  { %p731_p0 = por %p730_p13, %p729_p12 }
  0x40   :  { %p732_p1 = pnand %p731_p0, %p725_p11 }
  0x42   :  { %735 = shalt.err (!%p732_p1)
}
  0x43   :  { %91 = dma.hbm_to_vmem [thread:$0]  %s923_s8, 512, %s86_s22, [#allocation13], %s782_s25, %s782_s25, %s783_s26  }
  0x44   :  { %s100_s2 = sshll.u32 %s925_s10, 4  ;;  %s101_s2 = int_to_ptr.vmem [resolvable:$true] %s100_s2 }
  0x45   :  { %s736_s5 = scalar_lea.vmem %s101_s2, 16  ;;  %p741_p3 = scmp.lt.s32.totalorder %s101_s2, %s101_s2 }
  0x46   :  { %p737_p2 = scmp.ne.s32.totalorder %s101_s2, %s736_s5  ;;  %p742_p4 = scmp.lt.s32.totalorder %s736_s5, %s736_s5 }
  0x48   :  { %p743_p5 = por %p742_p4, %p741_p3 }
  0x4a   :  { %p744_p6 = pnand %p743_p5, %p737_p2 }
  0x4c   :  { %747 = shalt.err (!%p744_p6)
}
  0x4d   :  { %s788_s13 = smov [#allocation14]  }
  0x4e   :  { %103 = dma.vmem_to_smem %s101_s2, 16, %s788_s13, [#allocation5]  }
  0x4f   :  { %768 = dma.done.wait [#allocation3], 32  }
  0x50   :  { %769 = vsyncadd [#allocation3], 4294967264 }
  0x51   :  { %770 = dma.done.wait [#allocation7], 80  }
  0x52   :  { %771 = vsyncadd [#allocation7], 4294967216 }
  0x53   :  { %772 = dma.done.wait [#allocation10], 528  }
  0x54   :  { %773 = vsyncadd [#allocation10], 4294966768 }
  0x55   :  { %774 = dma.done.wait [#allocation13], 512  }
  0x56   :  { %775 = vsyncadd [#allocation13], 4294966784 }
  0x57   :  { %776 = dma.done.wait [#allocation5], 16  }
  0x58   :  { %777 = vsyncadd [#allocation5], 4294967280 }
  0x59   :  { %125 = sfence }
  0x5a   :  { %v130_v0 = vld [vmem:[%s915_s0 + $0x8] sm:$0xff]  ;;  %v129_v1 = vld [vmem:[%s915_s0] sm:$0xff]  ;;  %v789_v2 = vmov 0   ;;  %v790_v3 = vmov 1   ;;  %v791_v5 = vmov 2   ;;  %v201_v6 = vld [vmem:[#allocation9 + $0x10] sm:$0xff]  ;;  %v306_v40 = vlaneseq }
  0x5b   :  { %610 = vset.pattern.permute.xlu1 %v789_v2  ;;  %608 = vset.pattern.permute.xlu0 %v789_v2  ;;  %v202_v4 = vld [vmem:[#allocation9 + $0x18] sm:$0xff]  ;;  %v200_v7 = vld [vmem:[#allocation9 + $0x8] sm:$0xff]  ;;  %v199_v8 = vld [vmem:[#allocation9] sm:$0xff]  ;;  %vm299_vm0 = vcmask 58368   ;;  %s126_s0 = sld [smem:[#allocation14]]  ;;  %vm210_vm1 = vcmask 261120  }
  0x5c   :  { %140 = vperm.xlu1 %610, %v130_v0   ;;  %135 = vperm.xlu0 %608, %v129_v1   ;;  %v131_v9 = vld [vmem:[#allocation2] sm:$0x3]  ;;  %v534_v13 = vld [vmem:[#allocation6 + $0x1] ss:$0 sm:$0xff]  ;;  %v533_v16 = vld [vmem:[#allocation6] ss:$0 sm:$0xff] }
  0x5d   :  { %560 = vmatprep.subr.mxu0 %v202_v4  ;;  %v300_v10 = vsel %vm299_vm0, %v131_v9, 0.0  ;;  %v535_v19 = vld [vmem:[#allocation6 + $0x2] ss:$0 sm:$0xff]  ;;  %v536_v28 = vld [vmem:[#allocation8] ss:$0 sm:$0xff]  ;;  %v307_v41 = vshrl.u32 %v306_v40, 7 }
  0x5e   :  { %561 = vmatpush3.msra.mxu0 %v202_v4  ;;  %v792_v48 = vmov 0.0   ;;  %v339_v49 = vld [vmem:[%s921_s6 + $0x18] sm:$0xff]  ;;  %v338_v50 = vld [vmem:[%s921_s6 + $0x10] sm:$0xff]  ;;  %v337_v51 = vld [vmem:[%s921_s6 + $0x8] sm:$0xff]  ;;  %vm793_vm4 = vmmov 0   ;;  %s531_s21 = sld [smem:[#allocation14 + $0x1]] }
  0x5f   :  { %562 = vmatprep.subr.mxu0 %v201_v6  ;;  %v308_v42 = vsub.s32 0, %v307_v41  ;;  %v315_v45 = vsub.s32 1, %v307_v41  ;;  %571 = vmatprep.subr.mxu1 %v792_v48  ;;  %v336_v52 = vld [vmem:[%s921_s6] sm:$0xff]  ;;  %v537_v54 = vld [vmem:[#allocation11] ss:$0 sm:$0xff]  ;;  %vm349_vm7 = vcmask 1041409  }
  0x60   :  { %611 = vset.pattern.permute.xlu1 %v790_v3  ;;  %609 = vset.pattern.permute.xlu0 %v790_v3  ;;  %v430_v53 = vld [vmem:[#allocation12 + $0x18] sm:$0xff]  ;;  %s532_s6 = sld [smem:[#allocation14 + $0x2]]  ;;  %s794_s27 = smov [#allocation15]  }
  0x61   :  { %155 = vperm.xlu1 %611, %v130_v0   ;;  %151 = vperm.xlu0 %609, %v129_v1   ;;  %v194_v31 = vstv %s126_s0  ;;  %s518_s28 = sshll.u32 %s794_s27, 4  ;;  %s519_s28 = int_to_ptr.vmem [resolvable:$true] %s518_s28 }
  0x62   :  { %563 = vmatpush3.msra.mxu0 %v201_v6  ;;  %572 = vmatpush3.msra.mxu1 %v339_v49  ;;  %p753_p8 = scmp.lt.s32.totalorder %s519_s28, %s519_s28 }
  0x63   :  { %564 = vmatprep.subr.mxu0 %v200_v7  ;;  %573 = vmatprep.subr.mxu1 %v792_v48 }
  0x64   :  { %565 = vmatpush3.msra.mxu0 %v200_v7  ;;  %574 = vmatpush3.msra.mxu1 %v338_v50  ;;  %v294_v57 = vstv %s531_s21 }
  0x65   :  { %612 = vset.pattern.permute.xlu1 %v791_v5  ;;  %613 = vset.pattern.permute.xlu0 %v791_v5 }
  0x66   :  { %168 = vperm.xlu1 %612, %v129_v1   ;;  %172 = vperm.xlu0 %613, %v130_v0  }
  0x67   :  { %566 = vmatprep.subr.mxu0 %v199_v8  ;;  %575 = vmatprep.subr.mxu1 %v792_v48 }
  0x68   :  { %567 = vmatpush3.msra.mxu0 %v199_v8  ;;  %579 = vmatprep.mubr.msk.f32.mxu1 %vm793_vm4, %v792_v48 }
  0x69   :  { %582 = vmatprep.subr.mxu0 %v792_v48  ;;  %576 = vmatpush3.msra.mxu1 %v337_v51 }
  0x6a   :  { %577 = vmatprep.subr.mxu1 %v792_v48 }
  0x6b   :  { %578 = vmatpush3.msra.mxu1 %v336_v52 }
  0x8a   :  { %301 = vadd.xlane.f32.xlu1 %v300_v10 }
  0xd7   :  { %v141_v11 = vpop.permute.xlu1 %140  ;;  %v136_v12 = vpop.permute.xlu0 %135 }
  0xd8   :  { %v148_v20 = vmul.f32 %v533_v16, %v141_v11  ;;  %v147_v21 = vmul.f32 %v533_v16, %v136_v12 }
  0xdc   :  { %v156_v14 = vpop.permute.xlu1 %155  ;;  %v152_v15 = vpop.permute.xlu0 %151 }
  0xdd   :  { %v163_v17 = vmul.f32 %v534_v13, %v156_v14  ;;  %v162_v18 = vmul.f32 %v534_v13, %v152_v15 }
  0xdf   :  { %v165_v24 = vadd.f32 %v163_v17, %v148_v20  ;;  %v164_v25 = vadd.f32 %v162_v18, %v147_v21  ;;  %v428_v20 = vld [vmem:[#allocation12 + $0x8] sm:$0xff]  ;;  %v427_v21 = vld [vmem:[#allocation12] sm:$0xff] }
  0xe1   :  { %v169_v22 = vpop.permute.xlu1 %168  ;;  %v173_v23 = vpop.permute.xlu0 %172 }
  0xe2   :  { %v179_v26 = vmul.f32 %v535_v19, %v169_v22  ;;  %v180_v27 = vmul.f32 %v535_v19, %v173_v23  ;;  %v429_v19 = vld [vmem:[#allocation12 + $0x10] sm:$0xff] }
  0xe3   :  { %v540_v22 = vld [vmem:[%s922_s7] ss:$0 sm:$0xff]  ;;  %s748_s7 = scalar_lea.vmem %s519_s28, 32 }
  0xe4   :  { %v181_v29 = vadd.f32 %v179_v26, %v164_v25  ;;  %v182_v30 = vadd.f32 %v180_v27, %v165_v24  ;;  %v424_v24 = vstv %s532_s6  ;;  %p749_p7 = scmp.ne.s32.totalorder %s519_s28, %s748_s7  ;;  %p754_p9 = scmp.lt.s32.totalorder %s748_s7, %s748_s7 }
  0xe6   :  { %v190_v32 = vadd.f32 %v536_v28, %v181_v29  ;;  %v191_v33 = vadd.f32 %v536_v28, %v182_v30  ;;  %v542_v29 = vld [vmem:[%s924_s9] ss:$0 sm:$0xff]  ;;  %p755_p10 = por %p754_p9, %p753_p8 }
  0xe8   :  { %vm192_vm2 = vcmp.ge.f32.partialorder %v190_v32, 0.0  ;;  %v195_v34 = vmul.f32 %v194_v31, %v190_v32  ;;  %v196_v35 = vmul.f32 %v194_v31, %v191_v33  ;;  %vm193_vm3 = vcmp.ge.f32.partialorder %v191_v33, 0.0  ;;  %p756_p11 = pnand %p755_p10, %p749_p7 }
  0xea   :  { %v197_v36 = vsel %vm192_vm2, %v190_v32, %v195_v34  ;;  %v198_v37 = vsel %vm193_vm3, %v191_v33, %v196_v35 }
  0xeb   :  { %568 = vmatprep.mubr.msk.f32.mxu0 %vm210_vm1, %v197_v36 }
  0xec   :  { %569 = vmatmul.mubr.msk.f32.vlgmr.msra.gmra.mxu0 %vm210_vm1, %v198_v37 }
  0xed   :  { %590 = vmatprep.mubr.msk.f32.mxu0 %vm793_vm4, %v792_v48  ;;  %583 = vmatpush3.msra.mxu0 %v430_v53 }
  0xee   :  { %584 = vmatprep.subr.mxu0 %v792_v48 }
  0xef   :  { %585 = vmatpush3.msra.mxu0 %v429_v19 }
  0xf0   :  { %586 = vmatprep.subr.mxu0 %v792_v48 }
  0xf1   :  { %587 = vmatpush3.msra.mxu0 %v428_v20 }
  0xf2   :  { %588 = vmatprep.subr.mxu0 %v792_v48 }
  0xf3   :  { %589 = vmatpush3.msra.mxu0 %v427_v21 }
 0x113   :  { %v302_v38 = vpop.xlane.xlu1 %301 }
 0x114   :  { %v303_v39 = vmax.f32 %v302_v38, 1.0 }
 0x116   :  { %614 = vrcp.f32 %v303_v39 }
 0x123   :  { %v615_v43 = vpop.eup %614 }
 0x124   :  { %v305_v44 = vmul.f32 %v615_v43, %v131_v9 }
 0x126   :  { %v309_v46 = vrot.slane %v305_v44, %v308_v42  ;;  %v316_v47 = vrot.slane %v305_v44, %v315_v45 }
 0x128   :  { %311 = vbcast.lane.b32.xlu0 %v309_v46, 256 }
 0x12c   :  { %318 = vbcast.lane.b32.xlu0 %v316_v47, 256 }
 0x19a   :  { %v312_v55 = vpop.permute.xlu0 %311 }
 0x19e   :  { %v319_v63 = vpop.permute.xlu0 %318 }
 0x1ac   :  { %v570_v56 = vpop.f32.mrf.mxu0 }
 0x1ad   :  { %v289_v58 = vadd.f32 %v570_v56, %v537_v54 }
 0x1ae   :  { %v283_v59 = vpop.f32.mrf.mxu0 }
 0x1af   :  { %v296_v60 = vmul.f32 %v294_v57, %v289_v58  ;;  %v284_v61 = vadd.f32 %v537_v54, %v283_v59  ;;  %vm293_vm5 = vcmp.ge.f32.partialorder %v289_v58, 0.0 }
 0x1b1   :  { %vm292_vm6 = vcmp.ge.f32.partialorder %v284_v61, 0.0  ;;  %v295_v62 = vmul.f32 %v294_v57, %v284_v61  ;;  %v298_v0 = vsel %vm293_vm5, %v289_v58, %v296_v60 }
 0x1b2   :  { %v321_v1 = vmul.f32 %v319_v63, %v298_v0 }
 0x1b3   :  { %v297_v2 = vsel %vm292_vm6, %v284_v61, %v295_v62 }
 0x1b4   :  { %v320_v3 = vmul.f32 %v312_v55, %v297_v2  ;;  %v329_v4 = vsel %vm210_vm1, %v321_v1, 0.0 }
 0x1b5   :  { %v330_v5 = vrot.slane %v329_v4, 4 }
 0x1b6   :  { %v322_v6 = vsel %vm210_vm1, %v320_v3, 0.0 }
 0x1b7   :  { %v323_v7 = vrot.slane %v322_v6, 4  ;;  %v331_v8 = vadd.f32 %v330_v5, %v329_v4 }
 0x1b9   :  { %v324_v9 = vadd.f32 %v323_v7, %v322_v6  ;;  %v332_v10 = vrot.slane %v331_v8, 2 }
 0x1bb   :  { %v325_v11 = vrot.slane %v324_v9, 2  ;;  %v333_v12 = vadd.f32 %v332_v10, %v331_v8 }
 0x1bd   :  { %v334_v13 = vrot.slane %v333_v12, 1  ;;  %v326_v14 = vadd.f32 %v325_v11, %v324_v9 }
 0x1bf   :  { %v327_v15 = vrot.slane %v326_v14, 1  ;;  %v335_v16 = vadd.f32 %v334_v13, %v333_v12 }
 0x1c1   :  { %v328_v17 = vadd.f32 %v327_v15, %v326_v14 }
 0x1c3   :  { %v350_v18 = vsel %vm349_vm7, %v335_v16, %v328_v17 }
 0x1c4   :  { %580 = vmatmul.mubr.msk.f32.vlgmr.msra.gmra.mxu1 %vm210_vm1, %v350_v18 }
 0x284   :  { %v419_v23 = vpop.f32.mrf.mxu1 }
 0x285   :  { %v420_v25 = vadd.f32 %v540_v22, %v419_v23 }
 0x286   :  { %v581_v26 = vpop.f32.mrf.mxu1 }
 0x287   :  { %vm423_vm8 = vcmp.ge.f32.partialorder %v420_v25, 0.0  ;;  %v425_v27 = vmul.f32 %v424_v24, %v420_v25 }
 0x289   :  { %v426_v28 = vsel %vm423_vm8, %v420_v25, %v425_v27 }
 0x28a   :  { %591 = vmatmul.mubr.msk.f32.vlgmr.msra.gmra.mxu0 %vm210_vm1, %v426_v28 }
 0x34a   :  { %v507_v30 = vpop.f32.mrf.mxu0 }
 0x34b   :  { %v508_v31 = vadd.f32 %v542_v29, %v507_v30 }
 0x34c   :  { %v592_v32 = vpop.f32.mrf.mxu0 }
 0x34d   :  { %511 = vst [vmem:[#allocation15] sm:$0x3] %v508_v31 }
 0x34e   :  { %759 = shalt.err (!%p756_p11)
}
 0x34f   :  { %521 = dma.vmem_to_hbm [thread:$0]  %s519_s28, 32, %s926_s11, [#allocation4]  }
 0x350   :  { %778 = dma.done.wait [#allocation4], 32  }
 0x351   :  { %779 = vsyncadd [#allocation4], 4294967264 }
 0x352   :  { %525 = vsyncpa [#allocation3], 1 }
 0x353   :  { %526 = vsyncpa [#allocation7], 1 }
 0x354   :  { %527 = vsyncpa [#allocation10], 1 }
 0x355   :  { %528 = vsyncpa [#allocation13], 1 }
 0x356   :  { %529 = vsyncpa [#allocation4], 1 }
 0x357   :  { %530 = vsyncpa [#allocation5], 1 }

</bundles_post_ra>
